<compile_context>
chip_gen: v6e
topology: v6e:2x2x1
jax: 0.10.0
libtpu: 0.0.40
codegen_flags: <defaults>
</compile_context>

<pallas_src>
import jax
import jax.numpy as jnp
from jax.experimental import pallas as pl
from jax.experimental.pallas import tpu as pltpu

_HIDDEN = 128   # fixed hidden width of _QNetwork


def _qnet_kernel(x_ref, w1_ref, b1_ref, w2_ref, b2_ref, w3_ref, b3_ref, o_ref):
    # Cast x to bf16 in VMEM (VPU slack) so all matmuls run at bf16 MXU rate.
    x = x_ref[...].astype(jnp.bfloat16)
    # fc1 + relu : bf16 operands, f32 accumulation & epilogue.
    h = jnp.dot(x, w1_ref[...], preferred_element_type=jnp.float32)
    h = jnp.maximum(h + b1_ref[...], 0.0)
    # fc2 + relu
    h = jnp.dot(h.astype(jnp.bfloat16), w2_ref[...],
                preferred_element_type=jnp.float32)
    h = jnp.maximum(h + b2_ref[...], 0.0)
    # fc3 (no activation)
    out = jnp.dot(h.astype(jnp.bfloat16), w3_ref[...],
                  preferred_element_type=jnp.float32)
    o_ref[...] = (out + b3_ref[...]).astype(o_ref.dtype)


def _round_up(n, m):
    return ((n + m - 1) // m) * m


def prepare_params(params):
    """One-time param prep (hoisted out of the forward path).

    Casts weights to bf16 (MXU operands) and biases to f32 (epilogue).
    Re-run only after a parameter update.
    """
    return {
        "w1": params["w1"].astype(jnp.bfloat16),
        "b1": params["b1"].astype(jnp.float32).reshape(1, -1),
        "w2": params["w2"].astype(jnp.bfloat16),
        "b2": params["b2"].astype(jnp.float32).reshape(1, -1),
        "w3": params["w3"].astype(jnp.bfloat16),
        "b3": params["b3"].astype(jnp.float32).reshape(1, -1),
    }


def qnetwork_forward(x, prep, *, block_batch=2048):
    """Fused forward pass of _QNetwork.

    x:    (batch, input_dim) float32
    prep: output of prepare_params(...)
    returns (batch, output_dim) float32
    """
    batch, in_dim = x.shape
    out_dim = prep["w3"].shape[1]

    # Balanced batch tiling: enough tiles to cover the batch at <= block_batch
    # rows each, at least 2 tiles once there are >=16 rows (v7x megacore),
    # tile size rounded to the 8-sublane granule.
    n_tiles = pl.cdiv(batch, block_batch)
    if batch >= 16:
        n_tiles = max(n_tiles, 2)
    tb = _round_up(pl.cdiv(batch, n_tiles), 8)
    batch_pad = tb * n_tiles

    if batch_pad != batch:
        # Small row pad only (no lane padding, no dtype staging pass).
        x = jnp.pad(x, ((0, batch_pad - batch), (0, 0)))

    def row_spec(shape):
        return pl.BlockSpec(shape, lambda i: (i, 0))

    def const_spec(arr):
        return pl.BlockSpec(arr.shape, lambda i: (0, 0))

    out = pl.pallas_call(
        _qnet_kernel,
        out_shape=jax.ShapeDtypeStruct((batch_pad, out_dim), jnp.float32),
        grid=(n_tiles,),
        in_specs=[
            row_spec((tb, in_dim)),      # x: streamed per batch tile, unpadded
            const_spec(prep["w1"]),      # weights/biases: VMEM-resident
            const_spec(prep["b1"]),
            const_spec(prep["w2"]),
            const_spec(prep["b2"]),
            const_spec(prep["w3"]),
            const_spec(prep["b3"]),
        ],
        out_specs=row_spec((tb, out_dim)),   # unpadded lane dim: less writeback
        compiler_params=pltpu.CompilerParams(
            dimension_semantics=("parallel",),          # megacore on v7x
            vmem_limit_bytes=32 * 1024 * 1024,          # safe on v7x (64 MiB)
        ),
    )(x, prep["w1"], prep["b1"], prep["w2"], prep["b2"],
      prep["w3"], prep["b3"])

    return out[:batch] if batch_pad != batch else out


def init_params(key, input_dim, output_dim):
    """Deterministic synthetic init (shapes match _QNetwork.__init__)."""
    k1, k2, k3, k4, k5, k6 = jax.random.split(key, 6)
    s1 = 1.0 / jnp.sqrt(input_dim)
    s2 = 1.0 / jnp.sqrt(128.0)
    return {
        # stored as (in, out) = PyTorch weight.T
        "w1": jax.random.uniform(k1, (input_dim, _HIDDEN), jnp.float32, -s1, s1),
        "b1": jax.random.uniform(k2, (1, _HIDDEN), jnp.float32, -s1, s1),
        "w2": jax.random.uniform(k3, (_HIDDEN, _HIDDEN), jnp.float32, -s2, s2),
        "b2": jax.random.uniform(k4, (1, _HIDDEN), jnp.float32, -s2, s2),
        "w3": jax.random.uniform(k5, (_HIDDEN, output_dim), jnp.float32, -s2, s2),
        "b3": jax.random.uniform(k6, (1, output_dim), jnp.float32, -s2, s2),
    }


def reference_forward(x, p):
    h = jnp.maximum(x @ p["w1"] + p["b1"], 0.0)
    h = jnp.maximum(h @ p["w2"] + p["b2"], 0.0)
    return h @ p["w3"] + p["b3"]


if __name__ == "__main__":
    key = jax.random.PRNGKey(0)
    kx, kp = jax.random.split(key)

    # Small shapes consistent with the module.
    batch, input_dim, output_dim = 8, 16, 8
    x = jax.random.normal(kx, (batch, input_dim), dtype=jnp.float32)
    params = init_params(kp, input_dim, output_dim)
    prep = prepare_params(params)          # one-time param prep (hoisted)

    out = jax.block_until_ready(qnetwork_forward(x, prep))
    ref = reference_forward(x, params)
    assert out.shape == (batch, output_dim)
    # bf16 matmul operands with f32 accumulation -> loose-ish tolerance.
    assert jnp.allclose(out, ref, atol=5e-2, rtol=5e-2), (
        float(jnp.max(jnp.abs(out - ref))))

    # Second check: non-multiple batch -> 2 balanced tiles (152 rows each).
    kx2 = jax.random.fold_in(kx, 1)
    x2 = jax.random.normal(kx2, (300, input_dim), dtype=jnp.float32)
    out2 = jax.block_until_ready(qnetwork_forward(x2, prep))
    ref2 = reference_forward(x2, params)
    assert out2.shape == (300, output_dim)
    assert jnp.allclose(out2, ref2, atol=5e-2, rtol=5e-2), (
        float(jnp.max(jnp.abs(out2 - ref2))))

    print("KERNEL_OK")
</pallas_src>

<mosaic_0001>
module attributes {stable_mosaic.version = 11 : i64} {
  func.func @_qnet_kernel(%arg0: i32, %arg1: memref<8x16xf32, #tpu.memory_space<vmem>>, %arg2: memref<16x128xbf16, #tpu.memory_space<vmem>>, %arg3: memref<1x128xf32, #tpu.memory_space<vmem>>, %arg4: memref<128x128xbf16, #tpu.memory_space<vmem>>, %arg5: memref<1x128xf32, #tpu.memory_space<vmem>>, %arg6: memref<128x8xbf16, #tpu.memory_space<vmem>>, %arg7: memref<1x8xf32, #tpu.memory_space<vmem>>, %arg8: memref<8x8xf32, #tpu.memory_space<vmem>>) attributes {dimension_semantics = [#tpu.dimension_semantics<parallel>], iteration_bounds = array<i64: 1>, scalar_prefetch = 0 : i64, scratch_operands = 0 : i64, tpu.core_type = #tpu.core_type<tc>, window_params = [{transform_indices = @transform_0, window_bounds = array<i64: 8, 16>}, {pipeline_mode = #tpu.pipeline_mode<synchronous>, transform_indices = @transform_1, window_bounds = array<i64: 16, 128>}, {pipeline_mode = #tpu.pipeline_mode<synchronous>, transform_indices = @transform_2, window_bounds = array<i64: 1, 128>}, {pipeline_mode = #tpu.pipeline_mode<synchronous>, transform_indices = @transform_3, window_bounds = array<i64: 128, 128>}, {pipeline_mode = #tpu.pipeline_mode<synchronous>, transform_indices = @transform_4, window_bounds = array<i64: 1, 128>}, {pipeline_mode = #tpu.pipeline_mode<synchronous>, transform_indices = @transform_5, window_bounds = array<i64: 128, 8>}, {pipeline_mode = #tpu.pipeline_mode<synchronous>, transform_indices = @transform_6, window_bounds = array<i64: 1, 8>}, {transform_indices = @transform_7, window_bounds = array<i64: 8, 8>}]} {
    %c0 = arith.constant 0 : index
    %c0_0 = arith.constant 0 : index
    %0 = vector.load %arg1[%c0, %c0_0] : memref<8x16xf32, #tpu.memory_space<vmem>>, vector<8x16xf32>
    %1 = arith.truncf %0 : vector<8x16xf32> to vector<8x16xbf16>
    %c0_1 = arith.constant 0 : index
    %c0_2 = arith.constant 0 : index
    %2 = vector.load %arg2[%c0_1, %c0_2] : memref<16x128xbf16, #tpu.memory_space<vmem>>, vector<16x128xbf16>
    %cst = arith.constant dense<0.000000e+00> : vector<8x128xf32>
    %3 = tpu.matmul %1, %2, %cst {dimension_numbers = #tpu.dot_dimension_numbers<[1], [0], [0], [1], [0, 0, 1, 1], [], []>} : vector<8x16xbf16>, vector<16x128xbf16>, vector<8x128xf32> -> vector<8x128xf32>
    %c0_3 = arith.constant 0 : index
    %c0_4 = arith.constant 0 : index
    %4 = vector.load %arg3[%c0_3, %c0_4] : memref<1x128xf32, #tpu.memory_space<vmem>>, vector<1x128xf32>
    %5 = vector.broadcast %4 : vector<1x128xf32> to vector<8x128xf32>
    %6 = arith.addf %3, %5 : vector<8x128xf32>
    %cst_5 = arith.constant 0.000000e+00 : f32
    %7 = vector.broadcast %cst_5 : f32 to vector<8x128xf32>
    %8 = arith.maximumf %6, %7 : vector<8x128xf32>
    %9 = arith.truncf %8 : vector<8x128xf32> to vector<8x128xbf16>
    %c0_6 = arith.constant 0 : index
    %c0_7 = arith.constant 0 : index
    %10 = vector.load %arg4[%c0_6, %c0_7] : memref<128x128xbf16, #tpu.memory_space<vmem>>, vector<128x128xbf16>
    %cst_8 = arith.constant dense<0.000000e+00> : vector<8x128xf32>
    %11 = tpu.matmul %9, %10, %cst_8 {dimension_numbers = #tpu.dot_dimension_numbers<[1], [0], [0], [1], [0, 0, 1, 1], [], []>} : vector<8x128xbf16>, vector<128x128xbf16>, vector<8x128xf32> -> vector<8x128xf32>
    %c0_9 = arith.constant 0 : index
    %c0_10 = arith.constant 0 : index
    %12 = vector.load %arg5[%c0_9, %c0_10] : memref<1x128xf32, #tpu.memory_space<vmem>>, vector<1x128xf32>
    %13 = vector.broadcast %12 : vector<1x128xf32> to vector<8x128xf32>
    %14 = arith.addf %11, %13 : vector<8x128xf32>
    %cst_11 = arith.constant 0.000000e+00 : f32
    %15 = vector.broadcast %cst_11 : f32 to vector<8x128xf32>
    %16 = arith.maximumf %14, %15 : vector<8x128xf32>
    %17 = arith.truncf %16 : vector<8x128xf32> to vector<8x128xbf16>
    %c0_12 = arith.constant 0 : index
    %c0_13 = arith.constant 0 : index
    %18 = vector.load %arg6[%c0_12, %c0_13] : memref<128x8xbf16, #tpu.memory_space<vmem>>, vector<128x8xbf16>
    %cst_14 = arith.constant dense<0.000000e+00> : vector<8x8xf32>
    %19 = tpu.matmul %17, %18, %cst_14 {dimension_numbers = #tpu.dot_dimension_numbers<[1], [0], [0], [1], [0, 0, 1, 1], [], []>} : vector<8x128xbf16>, vector<128x8xbf16>, vector<8x8xf32> -> vector<8x8xf32>
    %c0_15 = arith.constant 0 : index
    %c0_16 = arith.constant 0 : index
    %20 = vector.load %arg7[%c0_15, %c0_16] : memref<1x8xf32, #tpu.memory_space<vmem>>, vector<1x8xf32>
    %21 = vector.broadcast %20 : vector<1x8xf32> to vector<8x8xf32>
    %22 = arith.addf %19, %21 : vector<8x8xf32>
    %c0_17 = arith.constant 0 : index
    %c0_18 = arith.constant 0 : index
    %23 = vector.load %arg8[%c0_17, %c0_18] : memref<8x8xf32, #tpu.memory_space<vmem>>, vector<8x8xf32>
    tpu.vector_store %arg8[%c0_17, %c0_18], %22 {strides = array<i32>} : memref<8x8xf32, #tpu.memory_space<vmem>>, vector<8x8xf32>,
    return
  }
  func.func @transform_0(%arg0: i32) -> (i32, i32) {
    %c0_i32 = arith.constant 0 : i32
    %c0_i32_0 = arith.constant 0 : i32
    return %arg0, %c0_i32 : i32, i32
  }
  func.func @transform_1(%arg0: i32) -> (i32, i32) {
    %c0_i32 = arith.constant 0 : i32
    %c0_i32_0 = arith.constant 0 : i32
    %c0_i32_1 = arith.constant 0 : i32
    return %c0_i32, %c0_i32_0 : i32, i32
  }
  func.func @transform_2(%arg0: i32) -> (i32, i32) {
    %c0_i32 = arith.constant 0 : i32
    %c0_i32_0 = arith.constant 0 : i32
    %c0_i32_1 = arith.constant 0 : i32
    return %c0_i32, %c0_i32_0 : i32, i32
  }
  func.func @transform_3(%arg0: i32) -> (i32, i32) {
    %c0_i32 = arith.constant 0 : i32
    %c0_i32_0 = arith.constant 0 : i32
    %c0_i32_1 = arith.constant 0 : i32
    return %c0_i32, %c0_i32_0 : i32, i32
  }
  func.func @transform_4(%arg0: i32) -> (i32, i32) {
    %c0_i32 = arith.constant 0 : i32
    %c0_i32_0 = arith.constant 0 : i32
    %c0_i32_1 = arith.constant 0 : i32
    return %c0_i32, %c0_i32_0 : i32, i32
  }
  func.func @transform_5(%arg0: i32) -> (i32, i32) {
    %c0_i32 = arith.constant 0 : i32
    %c0_i32_0 = arith.constant 0 : i32
    %c0_i32_1 = arith.constant 0 : i32
    return %c0_i32, %c0_i32_0 : i32, i32
  }
  func.func @transform_6(%arg0: i32) -> (i32, i32) {
    %c0_i32 = arith.constant 0 : i32
    %c0_i32_0 = arith.constant 0 : i32
    %c0_i32_1 = arith.constant 0 : i32
    return %c0_i32, %c0_i32_0 : i32, i32
  }
  func.func @transform_7(%arg0: i32) -> (i32, i32) {
    %c0_i32 = arith.constant 0 : i32
    %c0_i32_0 = arith.constant 0 : i32
    return %arg0, %c0_i32 : i32, i32
  }
}

</mosaic_0001>

<bundles_post_ra>
// kernel: tpu_custom_call.1
= control target key start
LH: loop header
LB: loop body
LE: loop exit
PB: predicated region body
PF: predicated region fallthrough
CT: control target
= control target key end

     0   :  { %12 = vsyncpa [#allocation3], 0  ;;  %s669_s0 = inlined_call_operand.vmem [shape: f32[8,16], index: 0, kind: input, shape index: {}]   ;;  %s670_s1 = inlined_call_operand.hbm [shape: bf16[16,128], index: 1, kind: input, shape index: {}]   ;;  %s671_s2 = inlined_call_operand.vmem [shape: f32[1,128], index: 2, kind: input, shape index: {}]   ;;  %s672_s3 = inlined_call_operand.vmem [shape: bf16[128,128], index: 3, kind: input, shape index: {}]   ;;  %s673_s4 = inlined_call_operand.hbm [shape: f32[1,128], index: 4, kind: input, shape index: {}]   ;;  %s674_s5 = inlined_call_operand.vmem [shape: bf16[128,8], index: 5, kind: input, shape index: {}]   ;;  %s675_s6 = inlined_call_operand.vmem [shape: f32[1,8], index: 6, kind: input, shape index: {}]   ;;  %s676_s7 = inlined_call_operand.hbm [shape: f32[8,8], index: 7, kind: output, shape index: {}]  }
   0x1   :  { %13 = vsyncpa [#allocation6], 0 }
   0x2   :  { %14 = vsyncpa [#allocation4], 0  ;;  %s536_s24 = smov [#allocation2]  }
   0x3   :  { %s22_s25 = sshll.u32 %s536_s24, 4  ;;  %s23_s25 = int_to_ptr.vmem [resolvable:$true] %s22_s25 }
   0x4   :  { %s478_s26 = scalar_lea.vmem %s23_s25, 128  ;;  %p483_p1 = scmp.lt.s32.totalorder %s23_s25, %s23_s25 }
   0x5   :  { %p479_p0 = scmp.ne.s32.totalorder %s23_s25, %s478_s26  ;;  %p484_p2 = scmp.lt.s32.totalorder %s478_s26, %s478_s26 }
   0x7   :  { %p485_p3 = por %p484_p2, %p483_p1 }
   0x9   :  { %p486_p4 = pnand %p485_p3, %p479_p0 }
   0xb   :  { %489 = shalt.err (!%p486_p4)
}
   0xc   :  { %s537_s27 = smov 64   ;;  %s538_s28 = smov 4  }
   0xd   :  { %28 = dma.hbm_to_vmem [thread:$0]  %s670_s1, 128, %s23_s25, [#allocation3], %s537_s27, %s537_s27, %s538_s28  }
   0xe   :  { %s539_s8 = smov [#allocation5]  }
   0xf   :  { %s39_s9 = sshll.u32 %s539_s8, 4  ;;  %s40_s9 = int_to_ptr.vmem [resolvable:$true] %s39_s9 }
  0x10   :  { %s498_s10 = scalar_lea.vmem %s40_s9, 16  ;;  %s502_s11 = scalar_lea.vmem %s40_s9, 32 }
  0x11   :  { %p499_p5 = scmp.ne.s32.totalorder %s40_s9, %s498_s10  ;;  %p503_p6 = scmp.lt.s32.totalorder %s40_s9, %s40_s9 }
  0x12   :  { %p504_p7 = scmp.lt.s32.totalorder %s502_s11, %s498_s10 }
  0x14   :  { %p505_p8 = por %p504_p7, %p503_p6 }
  0x16   :  { %p506_p9 = pnand %p505_p8, %p499_p5 }
  0x18   :  { %509 = shalt.err (!%p506_p9)
}
  0x19   :  { %42 = dma.hbm_to_vmem [thread:$0]  %s673_s4, 16, %s40_s9, [#allocation6]  }
  0x1a   :  { %530 = dma.done.wait [#allocation3], 128  }
  0x1b   :  { %531 = vsyncadd [#allocation3], 4294967168 }
  0x1c   :  { %532 = dma.done.wait [#allocation6], 16  }
  0x1d   :  { %533 = vsyncadd [#allocation6], 4294967280  ;;  %v540_v0 = vmov 0.0   ;;  %vm541_vm0 = vmmov 0   ;;  %v453_v1 = vld [vmem:[#allocation2] sm:$0xff]   ;;  %vm71_vm1 = vcmask 130048  }
  0x1e   :  { %400 = vmatprep.subr.bf16.mxu0 %v540_v0  ;;  %402 = vmatprep.mubr.msk.bf16.mxu0 %vm541_vm0, %v540_v0  ;;  %v54_v2 = vld [vmem:[%s669_s0] sm:$0xff]  ;;  %v454_v4 = vld [vmem:[%s672_s3 + $0x38] sm:$0xff]   ;;  %v455_v5 = vld [vmem:[%s672_s3 + $0x30] sm:$0xff]   ;;  %s542_s21 = smov [#allocation7]   ;;  %vm341_vm2 = vcmask 64512  }
  0x1f   :  { %406 = vmatprep.subr.bf16.mxu1 %v540_v0  ;;  %422 = vmatprep.mubr.msk.bf16.mxu1 %vm541_vm0, %v540_v0  ;;  %v55_v3 = vpack.c.bf16 %v54_v2, %v54_v2  ;;  %v456_v6 = vld [vmem:[%s672_s3 + $0x28] sm:$0xff]   ;;  %v457_v7 = vld [vmem:[%s672_s3 + $0x20] sm:$0xff]   ;;  %v458_v8 = vld [vmem:[%s672_s3 + $0x18] sm:$0xff]   ;;  %s349_s22 = sshll.u32 %s542_s21, 4  ;;  %s350_s22 = int_to_ptr.vmem [resolvable:$true] %s349_s22 }
  0x20   :  { %401 = vmatpush3.bf16.msra.mxu0 %v453_v1  ;;  %407 = vmatpush3.bf16.msra.mxu1 %v454_v4  ;;  %v459_v9 = vld [vmem:[%s672_s3 + $0x10] sm:$0xff]   ;;  %v460_v10 = vld [vmem:[%s672_s3 + $0x8] sm:$0xff]   ;;  %v461_v11 = vld [vmem:[%s672_s3] sm:$0xff]   ;;  %p515_p11 = scmp.lt.s32.totalorder %s350_s22, %s350_s22 }
  0x21   :  { %426 = vmatprep.subr.bf16.mxu0 %v540_v0  ;;  %408 = vmatprep.subr.bf16.mxu1 %v540_v0  ;;  %v462_v12 = vld [vmem:[%s674_s5 + $0x38] sm:$0xff]   ;;  %v463_v13 = vld [vmem:[%s674_s5 + $0x30] sm:$0xff]   ;;  %v464_v14 = vld [vmem:[%s674_s5 + $0x28] sm:$0xff]  }
  0x22   :  { %v465_v15 = vld [vmem:[%s674_s5 + $0x20] sm:$0xff]   ;;  %v466_v16 = vld [vmem:[%s674_s5 + $0x18] sm:$0xff]   ;;  %v467_v17 = vld [vmem:[%s674_s5 + $0x10] sm:$0xff]  }
  0x23   :  { %403 = vmatmul.mubr.msk.bf16.vlgmr.msra.gmra.mxu0 %vm71_vm1, %v55_v3  ;;  %v359_v18 = vld [vmem:[%s671_s2] ss:$0 sm:$0xff]  ;;  %v468_v26 = vld [vmem:[%s674_s5 + $0x8] sm:$0xff]  }
  0x24   :  { %442 = vmatprep.mubr.msk.bf16.mxu0 %vm541_vm0, %v540_v0  ;;  %409 = vmatpush3.bf16.msra.mxu1 %v455_v5  ;;  %v469_v27 = vld [vmem:[%s674_s5] sm:$0xff]   ;;  %v362_v28 = vld [vmem:[#allocation5] ss:$0 sm:$0xff]  ;;  %s510_s5 = scalar_lea.vmem %s350_s22, 128 }
  0x25   :  { %410 = vmatprep.subr.bf16.mxu1 %v540_v0  ;;  %427 = vmatpush3.bf16.msra.mxu0 %v462_v12  ;;  %v371_v36 = vld [vmem:[%s675_s6] ss:$0 sm:$0xff]  ;;  %p511_p10 = scmp.ne.s32.totalorder %s350_s22, %s510_s5  ;;  %p516_p12 = scmp.lt.s32.totalorder %s510_s5, %s510_s5 }
  0x26   :  { %428 = vmatprep.subr.bf16.mxu0 %v540_v0 }
  0x27   :  { %p517_p13 = por %p516_p12, %p515_p11 }
  0x28   :  { %411 = vmatpush3.bf16.msra.mxu1 %v456_v6 }
  0x29   :  { %412 = vmatprep.subr.bf16.mxu1 %v540_v0  ;;  %429 = vmatpush3.bf16.msra.mxu0 %v463_v13  ;;  %p518_p0 = pnand %p517_p13, %p511_p10 }
  0x2a   :  { %430 = vmatprep.subr.bf16.mxu0 %v540_v0 }
  0x2c   :  { %413 = vmatpush3.bf16.msra.mxu1 %v457_v7 }
  0x2d   :  { %414 = vmatprep.subr.bf16.mxu1 %v540_v0  ;;  %431 = vmatpush3.bf16.msra.mxu0 %v464_v14 }
  0x2e   :  { %432 = vmatprep.subr.bf16.mxu0 %v540_v0 }
  0x30   :  { %415 = vmatpush3.bf16.msra.mxu1 %v458_v8 }
  0x31   :  { %416 = vmatprep.subr.bf16.mxu1 %v540_v0  ;;  %433 = vmatpush3.bf16.msra.mxu0 %v465_v15 }
  0x32   :  { %434 = vmatprep.subr.bf16.mxu0 %v540_v0 }
  0x34   :  { %417 = vmatpush3.bf16.msra.mxu1 %v459_v9 }
  0x35   :  { %418 = vmatprep.subr.bf16.mxu1 %v540_v0  ;;  %435 = vmatpush3.bf16.msra.mxu0 %v466_v16 }
  0x36   :  { %436 = vmatprep.subr.bf16.mxu0 %v540_v0 }
  0x38   :  { %419 = vmatpush3.bf16.msra.mxu1 %v460_v10 }
  0x39   :  { %420 = vmatprep.subr.bf16.mxu1 %v540_v0  ;;  %437 = vmatpush3.bf16.msra.mxu0 %v467_v17 }
  0x3a   :  { %438 = vmatprep.subr.bf16.mxu0 %v540_v0 }
  0x3c   :  { %421 = vmatpush3.bf16.msra.mxu1 %v461_v11 }
  0x3d   :  { %439 = vmatpush3.bf16.msra.mxu0 %v468_v26 }
  0x3e   :  { %440 = vmatprep.subr.bf16.mxu0 %v540_v0 }
  0x41   :  { %441 = vmatpush3.bf16.msra.mxu0 %v469_v27 }
  0xe3   :  { %v109_v19 = vpop.f32.mrf.mxu0 }
  0xe4   :  { %v110_v20 = vadd.f32 %v359_v18, %v109_v19 }
  0xe5   :  { %v404_v21 = vpop.f32.mrf.mxu0 }
  0xe6   :  { %v115_v22 = vmax.f32 %v110_v20, 0.0 }
  0xe7   :  { %v112_v23 = vpop.f32.mrf.mxu0 }
  0xe8   :  { %v116_v24 = vpack.c.bf16 %v115_v22, %v115_v22 }
  0xe9   :  { %v405_v25 = vpop.f32.mrf.mxu0 }
  0xea   :  { %423 = vmatmul.mubr.bf16.vlgmr.msra.gmra.mxu1 %v116_v24 }
 0x1aa   :  { %v222_v29 = vpop.f32.mrf.mxu1 }
 0x1ab   :  { %v223_v30 = vadd.f32 %v362_v28, %v222_v29 }
 0x1ac   :  { %v424_v31 = vpop.f32.mrf.mxu1 }
 0x1ad   :  { %v228_v32 = vmax.f32 %v223_v30, 0.0 }
 0x1ae   :  { %v225_v33 = vpop.f32.mrf.mxu1 }
 0x1af   :  { %v229_v34 = vpack.c.bf16 %v228_v32, %v228_v32 }
 0x1b0   :  { %v425_v35 = vpop.f32.mrf.mxu1 }
 0x1b1   :  { %443 = vmatmul.mubr.bf16.vlgmr.msra.gmra.mxu0 %v229_v34 }
 0x271   :  { %v335_v37 = vpop.f32.mrf.mxu0 }
 0x272   :  { %v336_v38 = vadd.f32 %v371_v36, %v335_v37 }
 0x273   :  { %v444_v39 = vpop.f32.mrf.mxu0 }
 0x274   :  { %342 = vst.msk [vmem:[#allocation7] sm:$0xff] %vm341_vm2, %v336_v38 }
 0x275   :  { %v338_v40 = vpop.f32.mrf.mxu0 }
 0x276   :  { %521 = shalt.err (!%p518_p0)
}
 0x277   :  { %352 = dma.vmem_to_hbm [thread:$0]  %s350_s22, 128, %s676_s7, [#allocation4]   ;;  %v445_v41 = vpop.f32.mrf.mxu0 }
 0x278   :  { %534 = dma.done.wait [#allocation4], 128  }
 0x279   :  { %535 = vsyncadd [#allocation4], 4294967168 }
 0x27a   :  { %356 = vsyncpa [#allocation3], 1 }
 0x27b   :  { %357 = vsyncpa [#allocation6], 1 }
 0x27c   :  { %358 = vsyncpa [#allocation4], 1 }

</bundles_post_ra>
